<compile_context>
chip_gen: v7x
topology: tpu7x:2x2x1
jax: 0.10.0
libtpu: 0.0.40
codegen_flags: <defaults>
</compile_context>

<pallas_src>
import jax
import jax.numpy as jnp
from jax.experimental import pallas as pl
from jax.experimental.pallas import tpu as pltpu


def _round_up(n, m):
    return ((n + m - 1) // m) * m


def _pick_tile(padded_dim, unit, cap):
    """Largest multiple of `unit` <= cap that divides padded_dim (unit | padded_dim)."""
    c = min(cap, padded_dim)
    c -= c % unit
    while c > unit:
        if padded_dim % c == 0:
            return c
        c -= unit
    return unit


def _linear_no_sum_kernel(xT_ref, ew_ref, bias_ref, o_ref):
    # xT_ref:   (tf, B)  resident slab of transposed input (b-invariant)
    # ew_ref:   (tf, to) exp(weight) tile (precomputed in wrapper, b-invariant)
    # bias_ref: (tf, to) bias tile (b-invariant)
    # o_ref:    (tf, to) output tile at columns [b*Op + oi*to, ...)
    b = pl.program_id(2)
    x_all = xT_ref[...]                                        # (tf, B)
    lane = jax.lax.broadcasted_iota(jnp.int32, x_all.shape, 1)
    # Extract column b of xT as a (tf, 1) column (VPU select + XLU lane reduce;
    # both units have free slots in this store-bound kernel).
    x_col = jnp.sum(jnp.where(lane == b, x_all, 0.0), axis=1, keepdims=True)
    # Single broadcasted FMA per output element.
    o_ref[...] = x_col * ew_ref[...] + bias_ref[...]


def linear_no_sum(x, weight, bias, *, tile_f_cap=512, tile_o_cap=512):
    """x: (B, F); weight, bias: (F, O) -> (F, O*B) float32 (LinearNoSum.forward)."""
    B, F = x.shape
    Fw, O = weight.shape
    assert Fw == F and bias.shape == (F, O)

    Fp = _round_up(F, 8)      # sublane granularity
    Op = _round_up(O, 128)    # lane granularity -> unmasked, lane-dense stores

    ew = jnp.exp(weight.astype(jnp.float32))           # transcendental done ONCE
    bz = bias.astype(jnp.float32)
    xT = jnp.transpose(x.astype(jnp.float32))          # (F, B); tiny vs. output
    if Fp != F or Op != O:
        ew = jnp.pad(ew, ((0, Fp - F), (0, Op - O)))
        bz = jnp.pad(bz, ((0, Fp - F), (0, Op - O)))
    if Fp != F:
        xT = jnp.pad(xT, ((0, Fp - F), (0, 0)))

    tf = _pick_tile(Fp, 8, tile_f_cap)
    to = _pick_tile(Op, 128, tile_o_cap)
    o_blocks_per_batch = Op // to

    # Batch innermost -> weight/bias/x tiles are DMA'd once per (fi, oi) and
    # reused across all B batch steps.
    grid = (Fp // tf, Op // to, B)

    out = pl.pallas_call(
        _linear_no_sum_kernel,
        out_shape=jax.ShapeDtypeStruct((Fp, B * Op), jnp.float32),
        grid_spec=pltpu.PrefetchScalarGridSpec(
            num_scalar_prefetch=0,
            grid=grid,
            in_specs=[
                # transposed input slab: full batch width, one F tile; b-invariant
                pl.BlockSpec((tf, B), lambda fi, oi, b: (fi, 0)),
                # exp(weight) / bias tiles: b-invariant -> resident across batches
                pl.BlockSpec((tf, to), lambda fi, oi, b: (fi, oi)),
                pl.BlockSpec((tf, to), lambda fi, oi, b: (fi, oi)),
            ],
            # Write straight into the final (F, O*B) layout: batch b owns the
            # column range [b*Op, (b+1)*Op).
            out_specs=pl.BlockSpec(
                (tf, to),
                lambda fi, oi, b: (fi, b * o_blocks_per_batch + oi)),
        ),
        compiler_params=pltpu.CompilerParams(
            dimension_semantics=("parallel", "parallel", "arbitrary"),
            vmem_limit_bytes=32 * 1024 * 1024,
        ),
    )(xT, ew, bz)

    if Fp == F and Op == O:
        return out                                      # already the final layout
    # padded (small / odd-shape) case: strip lane/sublane padding
    return out.reshape(Fp, B, Op)[:F, :, :O].reshape(F, B * O)


if __name__ == "__main__":
    B = 2     # batch
    F = 16    # in_features
    O = 32    # out_features

    key = jax.random.PRNGKey(0)
    kx, kw, kb = jax.random.split(key, 3)
    x = jax.random.normal(kx, (B, F), dtype=jnp.float32)
    weight = jax.random.normal(kw, (F, O), dtype=jnp.float32)   # torch.randn(in, out)
    bias = jax.random.normal(kb, (F, O), dtype=jnp.float32)     # torch.randn(in, out)

    out = jax.block_until_ready(linear_no_sum(x, weight, bias))

    # pure-JAX reference of the PyTorch forward
    ref = jnp.concatenate(
        [x[b][:, None] * jnp.exp(weight) + bias for b in range(B)], axis=1)

    assert out.shape == (F, O * B), out.shape
    assert jnp.allclose(out, ref, atol=1e-5, rtol=1e-5), float(jnp.max(jnp.abs(out - ref)))
    print("KERNEL_OK")
</pallas_src>

<mosaic_0001>
module attributes {stable_mosaic.version = 11 : i64} {
  func.func @_linear_no_sum_kernel(%arg0: i32, %arg1: i32, %arg2: i32, %arg3: memref<16x2xf32, #tpu.memory_space<vmem>>, %arg4: memref<16x128xf32, #tpu.memory_space<vmem>>, %arg5: memref<16x128xf32, #tpu.memory_space<vmem>>, %arg6: memref<16x128xf32, #tpu.memory_space<vmem>>) attributes {dimension_semantics = [#tpu.dimension_semantics<parallel>, #tpu.dimension_semantics<parallel>, #tpu.dimension_semantics<arbitrary>], iteration_bounds = array<i64: 1, 1, 2>, scalar_prefetch = 0 : i64, scratch_operands = 0 : i64, tpu.core_type = #tpu.core_type<tc>, window_params = [{transform_indices = @transform_0, window_bounds = array<i64: 16, 2>}, {transform_indices = @transform_1, window_bounds = array<i64: 16, 128>}, {transform_indices = @transform_2, window_bounds = array<i64: 16, 128>}, {transform_indices = @transform_3, window_bounds = array<i64: 16, 128>}]} {
    %c0 = arith.constant 0 : index
    %c0_0 = arith.constant 0 : index
    %0 = vector.load %arg3[%c0, %c0_0] : memref<16x2xf32, #tpu.memory_space<vmem>>, vector<16x2xf32>
    %1 = tpu.iota {dimensions = array<i32: 1>} : vector<16x2xi32>
    %2 = vector.broadcast %arg2 : i32 to vector<16x2xi32>
    %3 = arith.cmpi eq, %1, %2 : vector<16x2xi32>
    %cst = arith.constant 0.000000e+00 : f32
    %4 = vector.broadcast %cst : f32 to vector<16x2xf32>
    %5 = arith.select %3, %0, %4 : vector<16x2xi1>, vector<16x2xf32>
    %cst_1 = arith.constant dense<0.000000e+00> : vector<16xf32>
    %6 = vector.multi_reduction <add>, %5, %cst_1 [1] : vector<16x2xf32> to vector<16xf32>
    %7 = vector.shape_cast %6 : vector<16xf32> to vector<16x1xf32>
    %c0_2 = arith.constant 0 : index
    %c0_3 = arith.constant 0 : index
    %8 = vector.load %arg4[%c0_2, %c0_3] : memref<16x128xf32, #tpu.memory_space<vmem>>, vector<16x128xf32>
    %9 = vector.broadcast %7 : vector<16x1xf32> to vector<16x128xf32>
    %10 = arith.mulf %9, %8 : vector<16x128xf32>
    %c0_4 = arith.constant 0 : index
    %c0_5 = arith.constant 0 : index
    %11 = vector.load %arg5[%c0_4, %c0_5] : memref<16x128xf32, #tpu.memory_space<vmem>>, vector<16x128xf32>
    %12 = arith.addf %10, %11 : vector<16x128xf32>
    %c0_6 = arith.constant 0 : index
    %c0_7 = arith.constant 0 : index
    %13 = vector.load %arg6[%c0_6, %c0_7] : memref<16x128xf32, #tpu.memory_space<vmem>>, vector<16x128xf32>
    tpu.vector_store %arg6[%c0_6, %c0_7], %12 {strides = array<i32>} : memref<16x128xf32, #tpu.memory_space<vmem>>, vector<16x128xf32>,
    return
  }
  func.func @transform_0(%arg0: i32, %arg1: i32, %arg2: i32) -> (i32, i32) {
    %c0_i32 = arith.constant 0 : i32
    %c0_i32_0 = arith.constant 0 : i32
    return %arg0, %c0_i32 : i32, i32
  }
  func.func @transform_1(%arg0: i32, %arg1: i32, %arg2: i32) -> (i32, i32) {
    %c0_i32 = arith.constant 0 : i32
    return %arg0, %arg1 : i32, i32
  }
  func.func @transform_2(%arg0: i32, %arg1: i32, %arg2: i32) -> (i32, i32) {
    %c0_i32 = arith.constant 0 : i32
    return %arg0, %arg1 : i32, i32
  }
  func.func @transform_3(%arg0: i32, %arg1: i32, %arg2: i32) -> (i32, i32) {
    %c1_i32 = arith.constant 1 : i32
    %0 = arith.muli %arg2, %c1_i32 : i32
    %1 = arith.addi %0, %arg1 : i32
    %c0_i32 = arith.constant 0 : i32
    return %arg0, %1 : i32, i32
  }
}

</mosaic_0001>

<bundles_post_ra>
// kernel: tpu_custom_call.1
= control target key start
LH: loop header
LB: loop body
LE: loop exit
PB: predicated region body
PF: predicated region fallthrough
CT: control target
= control target key end

     0   :  { %8 = vsyncpa [#allocation3], 0  ;;  %s795_s0 = inlined_call_operand.vmem [shape: f32[16,2], index: 0, kind: input, shape index: {}]   ;;  %s796_s1 = inlined_call_operand.vmem [shape: f32[16,128], index: 1, kind: input, shape index: {}]   ;;  %s797_s2 = inlined_call_operand.hbm [shape: f32[16,128], index: 2, kind: input, shape index: {}]   ;;  %s798_s3 = inlined_call_operand.hbm [shape: f32[16,256], index: 3, kind: output, shape index: {}]  }
   0x1   :  { %9 = vsyncpa [#allocation4], 0 }
   0x2   :  { %11 = vsyncpa [#allocation4 + $0x1], 0  ;;  %s634_s12 = smov 0   ;;  %s636_s13 = smov 0  }
   0x3   :  { %s638_s14 = smov 0   ;;  %s640_s15 = smov 0  }
   0x4   :  { %s642_s16 = smov 0   ;;  %s644_s17 = smov 0  }
   0x5 LB: > { %s411_s18 = sadd.s32 4294967295, %s605_s17   ;;  %s412_s19 = sadd.s32 4294967294, %s605_s17   ;;  %s605_s17 = sphi %s644_s17, %s17_s17   ;;  %s601_s16 = sphi %s642_s16, %s816_s16   ;;  %s597_s15 = sphi %s640_s15, %s815_s15   ;;  %s593_s14 = sphi %s638_s14, %s814_s14   ;;  %s589_s13 = sphi %s636_s13, %s813_s13   ;;  %s585_s12 = sphi %s634_s12, %s812_s12  }
   0x6   : > { %s29_s20 = sadd.s32 1, %s601_s16  ;;  %s129_s21 = sadd.s32 1, %s593_s14 }
   0x7   : > { %p30_p0 = scmp.ge.s32.totalorder %s29_s20, 2  ;;  %p139_p1 = scmp.ne.s32.totalorder %s593_s14, %s589_s13 }
   0x8   : > { %p140_p2 = scmp.eq.s32.totalorder %s411_s18, 1  ;;  %p145_p3 = scmp.ne.s32.totalorder %s589_s13, %s585_s12 }
   0x9   : > { %s818_s20 = smov (%p30_p0, %s29_s20), 0  ;;  %p146_p5 = scmp.eq.s32.totalorder %s412_s19, 1 }
   0xa   : > { %p674_p4 = por %p140_p2, %p139_p1  ;;  %s125_s23 = ssub.s32 %s601_s16, %s818_s20 }
   0xb   : > { %p413_p6 = scmp.ge.s32.totalorder %s605_s17, 1  ;;  %p127_p7 = scmp.eq.s32.totalorder %s125_s23, 0 }
   0xc   : > { %s803_s22 = scalar_select %p674_p4, 1, 0 }
   0xd   : > { %p681_p8 = por %p146_p5, %p145_p3  ;;  %p153_p9 = scmp.lt.s32.totalorder %s605_s17, 3 }
   0xe   : > { %s687_s25 = scalar_select %p127_p7, %s593_s14, %s129_s21  }
   0xf   : > { %s804_s24 = scalar_select %p681_p8, 1, 0 }
  0x10   : > { %p689_p10 = pnand %p413_p6, %p153_p9  ;;  %p693_p11 = scmp.eq.s32.totalorder %s411_s18, 0 }
  0x11   : > { %s607_s28 = smov [#allocation2]   ;;  %s495_s6 = scalar_lea.hbm %s797_s2, 256 }
  0x12   : > { %s805_s26 = scalar_select %p689_p10, 1, 0 }
  0x13   : > { %s806_s27 = scalar_select %p693_p11, 1, 0 }
  0x14   : > { %p430_p12 = pneg %p689_p10  ;;  %s190_s29 = sshll.u32 %s607_s28, 4  ;;  %s191_s29 = int_to_ptr.vmem [resolvable:$true] %s190_s29 }
  0x15   : > { %p496_p0 = scmp.ne.s32.totalorder %s797_s2, %s495_s6  ;;  %p502_p5 = scmp.lt.u32.totalorder %s495_s6, %s797_s2 }
  0x16   : > { %p701_p13 = pnand %p693_p11, %p430_p12 }
  0x18   : > { %p497_p1 = pneg %p701_p13 }
  0x1a   : > { %p498_p2 = pnand %p497_p1, %p496_p0 }
  0x1c   : > { %p499_p3 = pneg %p498_p2 }
  0x1e   : > { %p504_p6 = pnand %p502_p5, %p499_p3 }
  0x20   : > { %507 = shalt.err (!%p504_p6)
}
  0x21   : > { %s508_s11 = scalar_lea.vmem %s191_s29, 256  ;;  %p516_p8 = scmp.lt.s32.totalorder %s191_s29, %s191_s29 }
  0x22   : > { %p509_p7 = scmp.ne.s32.totalorder %s191_s29, %s508_s11  ;;  %p517_p4 = scmp.lt.s32.totalorder %s508_s11, %s508_s11 }
  0x24   : > { %p511_p9 = pnand %p509_p7, %p497_p1  ;;  %p518_p11 = por %p517_p4, %p516_p8 }
  0x26   : > { %p512_p12 = pneg %p511_p9 }
  0x28   : > { %p519_p10 = pnand %p518_p11, %p512_p12 }
  0x2a   : > { %522 = shalt.err (!%p519_p10)
}
  0x2b   : > { %s608_s18 = smov 128   ;;  %s609_s19 = smov 8  }
  0x2c   : > { %433 = dma.hbm_to_vmem [thread:$0]  (!%p701_p13), %s797_s2, 256, %s191_s29, [#allocation3], %s608_s18, %s608_s18, %s609_s19  }
  0x2d   : > { %p808_p0 = scmp.ne.s32.totalorder %s805_s26, 0 }
  0x2e   : > { %p809_p2 = scmp.ne.s32.totalorder (!%p808_p0), %s806_s27, 0 }
  0x2f   : > { %206 = sbr.rel (%p808_p0) target bundleno = 228 (0xe4), region = 32 }
  0x36   : > { %576 = dma.done.wait (%p809_p2), [#allocation3], 256  }
  0x37   : > { %578 = vsyncadd (%p809_p2), [#allocation3], 4294967040  ;;  %v258_v0 = vlaneseq  ;;  %v260_v2 = vstv %s597_s15  ;;  %vm264_vm1 = vcmask 15360   ;;  %v256_v3 = vld [vmem:[%s795_s0] sm:$0xff]  ;;  %v257_v4 = vld [vmem:[%s795_s0 + $0x8] sm:$0xff]  ;;  %s235_s27 = sand.u32 1, %s589_s13  }
  0x38   : > { %s419_s4 = sshll.u32 %s235_s27, 4  ;;  %v271_v9 = vld [vmem:[%s796_s1] sm:$0xff]  ;;  %v272_v13 = vld [vmem:[%s796_s1 + $0x8] sm:$0xff]  ;;  %s421_s11 = sshll.u32 %s597_s15, 7 }
  0x39   : > { %v259_v1 = vand.u32 127, %v258_v0  ;;  %v275_v10 = vld [vmem:[#allocation2] sm:$0xff]  ;;  %s237_s7 = scalar_lea.vmem [#allocation5], %s419_s4  ;;  %v276_v15 = vld [vmem:[#allocation2 + $0x8] sm:$0xff]  ;;  %s747_s21 = scalar_lea.hbm %s798_s3, %s421_s11 }
  0x3a   : > { %s298_s8 = sshll.u32 %s237_s7, 4  ;;  %s749_s23 = scalar_lea.sflag [#allocation4], %s235_s27  ;;  %s742_s8 = int_to_ptr.vmem [resolvable:$true] %s298_s8 }
  0x3b   : > { %vm261_vm0 = vcmp.eq.s32.totalorder %v259_v1, %v260_v2  ;;  %s523_s28 = scalar_lea.vmem %s742_s8, 256  ;;  %p810_p8 = scmp.ne.s32.totalorder %s803_s22, 0 }
  0x3c   : > { %v262_v5 = vsel %vm261_vm0, %v256_v3, 0.0  ;;  %v263_v6 = vsel %vm261_vm0, %v257_v4, 0.0  ;;  %p524_p4 = scmp.ne.s32.totalorder %s742_s8, %s523_s28  ;;  %s610_s15 = smov [#allocation5]  }
  0x3d   : > { %v265_v7 = vsel %vm264_vm1, %v262_v5, 0.0  ;;  %v268_v8 = vsel %vm264_vm1, %v263_v6, 0.0  ;;  %s527_s30 = sshll.u32 %s610_s15, 4  ;;  %s528_s30 = int_to_ptr.vmem [resolvable:$false] %s527_s30 }
  0x3e   : > { %266 = vadd.xlane.f32.xlu0 %v265_v7  ;;  %p525_p10 = pnand %p524_p4, %p810_p8  ;;  %s529_s29 = scalar_lea.vmem %s528_s30, 512 }
  0x3f   : > { %p530_p13 = scmp.lt.s32.totalorder %s742_s8, %s528_s30  ;;  %p531_p1 = scmp.lt.s32.totalorder %s529_s29, %s523_s28 }
  0x40   : > { %p526_p11 = pneg %p525_p10 }
  0x41   : > { %p532_p3 = por %p531_p1, %p530_p13 }
  0x42   : > { %269 = vadd.xlane.f32.xlu0 %v268_v8 }
  0x43   : > { %p533_p5 = pnand %p532_p3, %p526_p11 }
  0xcb   : > { %v267_v11 = vpop.xlane.xlu0 %266 }
  0xcc   : > { %v273_v12 = vmul.f32 %v271_v9, %v267_v11 }
  0xce   : > { %v277_v14 = vadd.f32 %v275_v10, %v273_v12 }
  0xcf   : > { %v270_v16 = vpop.xlane.xlu0 %269 }
  0xd0   : > { %279 = vst [vmem:[%s237_s7] sm:$0xff] %v277_v14  ;;  %v274_v17 = vmul.f32 %v272_v13, %v270_v16 }
  0xd2   : > { %v278_v18 = vadd.f32 %v276_v15, %v274_v17 }
  0xd4   : > { %280 = vst [vmem:[%s237_s7 + $0x8] sm:$0xff] %v278_v18 }
  0xd5   : > { %536 = shalt.err (!%p533_p5)
}
  0xd6   : > { %s537_s26 = scalar_lea.hbm %s747_s21, 256  ;;  %s541_s5 = scalar_lea.hbm %s798_s3, 512 }
  0xd7   : > { %p538_p6 = scmp.ne.s32.totalorder %s747_s21, %s537_s26  ;;  %p542_p12 = scmp.lt.u32.totalorder %s747_s21, %s798_s3 }
  0xd8   : > { %p543_p0 = scmp.lt.u32.totalorder %s541_s5, %s537_s26  ;;  %p545_p4 = scmp.lt.u32.totalorder %s537_s26, %s747_s21 }
  0xd9   : > { %p539_p7 = pnand %p538_p6, %p810_p8 }
  0xda   : > { %p544_p2 = por %p543_p0, %p542_p12 }
  0xdb   : > { %p540_p9 = pneg %p539_p7 }
  0xdc   : > { %p546_p10 = por %p545_p4, %p544_p2 }
  0xde   : > { %p547_p11 = pnand %p546_p10, %p540_p9 }
  0xe0   : > { %550 = shalt.err (!%p547_p11)
}
  0xe1   : > { %s611_s9 = smov 128   ;;  %s612_s10 = smov 256  }
  0xe2   : > { %s613_s11 = smov 8  }
  0xe3   : > { %428 = dma.vmem_to_hbm [thread:$0]  (%p810_p8), %s742_s8, 256, %s747_s21, %s749_s23, %s611_s9, %s612_s10, %s613_s11  }
  0xe4 PF: > { %p440_p13 = scmp.ge.s32.totalorder %s605_s17, 2  ;;  %s313_s18 = sand.u32 1, %s585_s12  }
  0xe5   : > { %p811_p1 = scmp.ne.s32.totalorder %s804_s24, 0  ;;  %s314_s19 = scalar_lea.sflag [#allocation4], %s313_s18 }
  0xe7   : > { %p435_p3 = pnand %p440_p13, %p811_p1 }
  0xe9   : > { %580 = dma.done.wait (!%p435_p3), %s314_s19, 256  }
  0xea   : > { %582 = vsyncadd (!%p435_p3), %s314_s19, 4294967040  ;;  %s17_s17 = sadd.s32 1, %s605_s17   ;;  %s812_s12 = smov %s589_s13 }
  0xeb   : > { %p14_p5 = scmp.ge.s32.totalorder %s17_s17, 4   ;;  %s813_s13 = smov %s593_s14 }
  0xec   : > { %s814_s14 = smov %s687_s25  ;;  %s815_s15 = smov %s601_s16 }
  0xed   : > { %s816_s16 = smov %s818_s20  ;;  %16 = sbr.rel (!%p14_p5) target bundleno = 5 (0x5), region = 76 }
  0xf4   :  { %319 = vsyncpa [#allocation3], 1 }
  0xf5   :  { %321 = vsyncpa [#allocation3 + $0x1], 1 }
  0xf6   :  { %322 = vsyncpa [#allocation4], 1 }
  0xf7   :  { %324 = vsyncpa [#allocation4 + $0x1], 1 }

</bundles_post_ra>
